<compile_context>
chip_gen: v7x
topology: tpu7x:2x2x1
jax: 0.10.0
libtpu: 0.0.40
codegen_flags: <defaults>
</compile_context>

<pallas_src>
import jax
import jax.numpy as jnp
from jax.experimental import pallas as pl
from jax.experimental.pallas import tpu as pltpu

LANE = 128     # lane width (last-dim tiling)
SUBLANE = 8    # f32 sublane height


def _round_up(x, m):
    return ((x + m - 1) // m) * m


def _qnetwork_kernel(x_ref, w1_ref, b1_ref, w2_ref, b2_ref, w3_ref, b3_ref, o_ref):
    # One batch tile per grid step; weights/biases are resident in VMEM.
    cd = w1_ref.dtype
    x = x_ref[...].astype(cd)  # cast the f32 state in-kernel, only for the dot operand
    # MXU matmuls with f32 accumulation; bias-add/ReLU in f32 on the VPU.
    h1 = jnp.dot(x, w1_ref[...], preferred_element_type=jnp.float32) + b1_ref[...]
    h1 = jnp.maximum(h1, 0.0)
    h2 = jnp.dot(h1.astype(cd), w2_ref[...],
                 preferred_element_type=jnp.float32) + b2_ref[...]
    h2 = jnp.maximum(h2, 0.0)
    out = jnp.dot(h2.astype(cd), w3_ref[...],
                  preferred_element_type=jnp.float32) + b3_ref[...]
    o_ref[...] = out.astype(o_ref.dtype)


def init_params(key, state_size, action_size, hidden_size):
    """Deterministic init mimicking nn.Linear default U[-1/sqrt(fan_in), +1/sqrt(fan_in)].
    Weights are stored [in, out] (transposed relative to PyTorch)."""
    ks = jax.random.split(key, 6)

    def lin(kw, kb, fan_in, fan_out):
        bound = 1.0 / jnp.sqrt(jnp.float32(fan_in))
        w = jax.random.uniform(kw, (fan_in, fan_out), jnp.float32, -bound, bound)
        b = jax.random.uniform(kb, (1, fan_out), jnp.float32, -bound, bound)
        return w, b

    w1, b1 = lin(ks[0], ks[1], state_size, hidden_size)
    w2, b2 = lin(ks[2], ks[3], hidden_size, hidden_size)
    w3, b3 = lin(ks[4], ks[5], hidden_size, action_size)
    return {"w1": w1, "b1": b1, "w2": w2, "b2": b2, "w3": w3, "b3": b3}


def pad_params(params, compute_dtype=jnp.bfloat16):
    """Zero-pad hidden/action feature dims to 128-lane multiples and cast the
    matmul weights to compute_dtype (bf16 default: MXU-native on v6e/v7x).
    Biases stay f32.  w1 keeps its real [state_size] contraction dim so the
    kernel never contracts over zero rows and the state needs no padding."""
    w1, b1 = params["w1"], params["b1"]
    w2, b2 = params["w2"], params["b2"]
    w3, b3 = params["w3"], params["b3"]
    S, H = w1.shape
    A = w3.shape[1]
    H_pad = _round_up(H, LANE)
    A_pad = _round_up(A, LANE)

    def pad2(x, rows, cols):
        return jnp.pad(x, ((0, rows - x.shape[0]), (0, cols - x.shape[1])))

    return {
        "w1": pad2(w1, S, H_pad).astype(compute_dtype),
        "b1": pad2(b1, 1, H_pad).astype(jnp.float32),
        "w2": pad2(w2, H_pad, H_pad).astype(compute_dtype),
        "b2": pad2(b2, 1, H_pad).astype(jnp.float32),
        "w3": pad2(w3, H_pad, A_pad).astype(compute_dtype),
        "b3": pad2(b3, 1, A_pad).astype(jnp.float32),
        "state_size": S,
        "action_size": A,
    }


def qnetwork_forward(state, padded_params, *, batch_tile=None, out_dtype=jnp.float32):
    """state: [B, state_size] float32. padded_params: output of pad_params().
    out_dtype=bf16 halves the output writeback if the consumer tolerates it."""
    p = padded_params
    w1, b1, w2, b2, w3, b3 = p["w1"], p["b1"], p["w2"], p["b2"], p["w3"], p["b3"]
    A = p["action_size"]
    S = w1.shape[0]
    A_pad = w3.shape[1]
    B = state.shape[0]

    # bf16 values want native (16,128) packing; f32 wants (8,128).
    align = SUBLANE * max(1, 4 // jnp.dtype(w1.dtype).itemsize)

    if batch_tile is None:
        if B <= 128:
            # Single grid step; block dims equal to the full array dims are
            # always legal, so no batch padding is needed for tiny batches.
            TB = B
        else:
            # ~8 grid steps for big batches (>=2 per v7x TensorCore) so the
            # x-prefetch / out-writeback pipeline overlaps compute, while
            # keeping >=128 rows per step to amortize per-step overhead.
            # Cap TB so the f32 intermediates stay small; VMEM is otherwise
            # not a constraint (~hundreds of KB resident).
            n_steps = min(8, pl.cdiv(B, 128))
            TB = min(2048, _round_up(pl.cdiv(B, n_steps), align))
    else:
        TB = _round_up(batch_tile, align)  # defensive sublane alignment
        if TB >= B:
            TB = B

    grid = (pl.cdiv(B, TB),)

    tiled = lambda shape: pl.BlockSpec(shape, lambda i: (i, 0))       # varies w/ batch
    resident = lambda arr: pl.BlockSpec(arr.shape, lambda i: (0, 0))  # stays in VMEM

    out = pl.pallas_call(
        _qnetwork_kernel,
        out_shape=jax.ShapeDtypeStruct((B, A_pad), out_dtype),
        grid=grid,
        in_specs=[
            tiled((TB, S)),
            resident(w1), resident(b1),
            resident(w2), resident(b2),
            resident(w3), resident(b3),
        ],
        out_specs=tiled((TB, A_pad)),
        compiler_params=pltpu.CompilerParams(
            dimension_semantics=("parallel",)),
    )(state, w1, b1, w2, b2, w3, b3)

    # Rows are already exactly B (cdiv grid, masked ragged tile); only the
    # lane-padding columns are trimmed.  Consumers that reduce over actions
    # (max/argmax) can take the padded array directly and skip this copy.
    return out[:, :A]


def qnetwork_ref(state, params, compute_dtype=jnp.float32):
    """Pure-JAX reference (same dtype policy as the kernel) for validation."""
    cd = compute_dtype
    x = state.astype(cd)
    h1 = jnp.maximum(
        jnp.dot(x, params["w1"].astype(cd), preferred_element_type=jnp.float32)
        + params["b1"], 0.0)
    h2 = jnp.maximum(
        jnp.dot(h1.astype(cd), params["w2"].astype(cd),
                preferred_element_type=jnp.float32) + params["b2"], 0.0)
    return (jnp.dot(h2.astype(cd), params["w3"].astype(cd),
                    preferred_element_type=jnp.float32) + params["b3"])


if __name__ == "__main__":
    batch, state_size, action_size, hidden_size = 2, 16, 4, 32

    key = jax.random.PRNGKey(0)
    k_params, k_state, k_big = jax.random.split(key, 3)
    params = init_params(k_params, state_size, action_size, hidden_size)

    # --- small f32 case (shapes implied by the PyTorch module) ---
    state = jax.random.normal(k_state, (batch, state_size), jnp.float32)
    padded_f32 = pad_params(params, compute_dtype=jnp.float32)
    out = jax.block_until_ready(qnetwork_forward(state, padded_f32))
    ref = qnetwork_ref(state, params, compute_dtype=jnp.float32)
    assert out.shape == (batch, action_size)
    assert jnp.allclose(out, ref, atol=1e-5, rtol=1e-5), "f32 mismatch vs reference"

    # --- larger-batch bf16 case: exercises the multi-step cdiv grid (ragged
    #     last tile), resident bf16 weights, in-kernel state cast, and the
    #     lane-dense 128-wide output store ---
    big_batch = 1000
    big_state = jax.random.normal(k_big, (big_batch, state_size), jnp.float32)
    padded_bf16 = pad_params(params)  # default bf16 compute dtype
    out_big = jax.block_until_ready(qnetwork_forward(big_state, padded_bf16))
    ref_big = qnetwork_ref(big_state, params, compute_dtype=jnp.bfloat16)
    assert out_big.shape == (big_batch, action_size)
    assert jnp.allclose(out_big, ref_big, atol=2e-2, rtol=2e-2), "bf16 mismatch vs reference"

    print("KERNEL_OK")
</pallas_src>

<mosaic_0001>
module attributes {stable_mosaic.version = 11 : i64} {
  func.func @_qnetwork_kernel(%arg0: i32, %arg1: memref<2x16xf32, #tpu.memory_space<vmem>>, %arg2: memref<16x128xf32, #tpu.memory_space<vmem>>, %arg3: memref<1x128xf32, #tpu.memory_space<vmem>>, %arg4: memref<128x128xf32, #tpu.memory_space<vmem>>, %arg5: memref<1x128xf32, #tpu.memory_space<vmem>>, %arg6: memref<128x128xf32, #tpu.memory_space<vmem>>, %arg7: memref<1x128xf32, #tpu.memory_space<vmem>>, %arg8: memref<2x128xf32, #tpu.memory_space<vmem>>) attributes {dimension_semantics = [#tpu.dimension_semantics<parallel>], iteration_bounds = array<i64: 1>, scalar_prefetch = 0 : i64, scratch_operands = 0 : i64, tpu.core_type = #tpu.core_type<tc>, window_params = [{transform_indices = @transform_0, window_bounds = array<i64: 2, 16>}, {pipeline_mode = #tpu.pipeline_mode<synchronous>, transform_indices = @transform_1, window_bounds = array<i64: 16, 128>}, {pipeline_mode = #tpu.pipeline_mode<synchronous>, transform_indices = @transform_2, window_bounds = array<i64: 1, 128>}, {pipeline_mode = #tpu.pipeline_mode<synchronous>, transform_indices = @transform_3, window_bounds = array<i64: 128, 128>}, {pipeline_mode = #tpu.pipeline_mode<synchronous>, transform_indices = @transform_4, window_bounds = array<i64: 1, 128>}, {pipeline_mode = #tpu.pipeline_mode<synchronous>, transform_indices = @transform_5, window_bounds = array<i64: 128, 128>}, {pipeline_mode = #tpu.pipeline_mode<synchronous>, transform_indices = @transform_6, window_bounds = array<i64: 1, 128>}, {transform_indices = @transform_7, window_bounds = array<i64: 2, 128>}]} {
    %c0 = arith.constant 0 : index
    %c0_0 = arith.constant 0 : index
    %0 = vector.load %arg1[%c0, %c0_0] : memref<2x16xf32, #tpu.memory_space<vmem>>, vector<2x16xf32>
    %c0_1 = arith.constant 0 : index
    %c0_2 = arith.constant 0 : index
    %1 = vector.load %arg2[%c0_1, %c0_2] : memref<16x128xf32, #tpu.memory_space<vmem>>, vector<16x128xf32>
    %cst = arith.constant dense<0.000000e+00> : vector<2x128xf32>
    %2 = tpu.matmul %0, %1, %cst {dimension_numbers = #tpu.dot_dimension_numbers<[1], [0], [0], [1], [0, 0, 1, 1], [], []>} : vector<2x16xf32>, vector<16x128xf32>, vector<2x128xf32> -> vector<2x128xf32>
    %c0_3 = arith.constant 0 : index
    %c0_4 = arith.constant 0 : index
    %3 = vector.load %arg3[%c0_3, %c0_4] : memref<1x128xf32, #tpu.memory_space<vmem>>, vector<1x128xf32>
    %4 = vector.broadcast %3 : vector<1x128xf32> to vector<2x128xf32>
    %5 = arith.addf %2, %4 : vector<2x128xf32>
    %cst_5 = arith.constant 0.000000e+00 : f32
    %6 = vector.broadcast %cst_5 : f32 to vector<2x128xf32>
    %7 = arith.maximumf %5, %6 : vector<2x128xf32>
    %c0_6 = arith.constant 0 : index
    %c0_7 = arith.constant 0 : index
    %8 = vector.load %arg4[%c0_6, %c0_7] : memref<128x128xf32, #tpu.memory_space<vmem>>, vector<128x128xf32>
    %cst_8 = arith.constant dense<0.000000e+00> : vector<2x128xf32>
    %9 = tpu.matmul %7, %8, %cst_8 {dimension_numbers = #tpu.dot_dimension_numbers<[1], [0], [0], [1], [0, 0, 1, 1], [], []>} : vector<2x128xf32>, vector<128x128xf32>, vector<2x128xf32> -> vector<2x128xf32>
    %c0_9 = arith.constant 0 : index
    %c0_10 = arith.constant 0 : index
    %10 = vector.load %arg5[%c0_9, %c0_10] : memref<1x128xf32, #tpu.memory_space<vmem>>, vector<1x128xf32>
    %11 = vector.broadcast %10 : vector<1x128xf32> to vector<2x128xf32>
    %12 = arith.addf %9, %11 : vector<2x128xf32>
    %cst_11 = arith.constant 0.000000e+00 : f32
    %13 = vector.broadcast %cst_11 : f32 to vector<2x128xf32>
    %14 = arith.maximumf %12, %13 : vector<2x128xf32>
    %c0_12 = arith.constant 0 : index
    %c0_13 = arith.constant 0 : index
    %15 = vector.load %arg6[%c0_12, %c0_13] : memref<128x128xf32, #tpu.memory_space<vmem>>, vector<128x128xf32>
    %cst_14 = arith.constant dense<0.000000e+00> : vector<2x128xf32>
    %16 = tpu.matmul %14, %15, %cst_14 {dimension_numbers = #tpu.dot_dimension_numbers<[1], [0], [0], [1], [0, 0, 1, 1], [], []>} : vector<2x128xf32>, vector<128x128xf32>, vector<2x128xf32> -> vector<2x128xf32>
    %c0_15 = arith.constant 0 : index
    %c0_16 = arith.constant 0 : index
    %17 = vector.load %arg7[%c0_15, %c0_16] : memref<1x128xf32, #tpu.memory_space<vmem>>, vector<1x128xf32>
    %18 = vector.broadcast %17 : vector<1x128xf32> to vector<2x128xf32>
    %19 = arith.addf %16, %18 : vector<2x128xf32>
    %c0_17 = arith.constant 0 : index
    %c0_18 = arith.constant 0 : index
    %20 = vector.load %arg8[%c0_17, %c0_18] : memref<2x128xf32, #tpu.memory_space<vmem>>, vector<2x128xf32>
    tpu.vector_store %arg8[%c0_17, %c0_18], %19 {strides = array<i32>} : memref<2x128xf32, #tpu.memory_space<vmem>>, vector<2x128xf32>,
    return
  }
  func.func @transform_0(%arg0: i32) -> (i32, i32) {
    %c0_i32 = arith.constant 0 : i32
    %c0_i32_0 = arith.constant 0 : i32
    return %arg0, %c0_i32 : i32, i32
  }
  func.func @transform_1(%arg0: i32) -> (i32, i32) {
    %c0_i32 = arith.constant 0 : i32
    %c0_i32_0 = arith.constant 0 : i32
    %c0_i32_1 = arith.constant 0 : i32
    return %c0_i32, %c0_i32_0 : i32, i32
  }
  func.func @transform_2(%arg0: i32) -> (i32, i32) {
    %c0_i32 = arith.constant 0 : i32
    %c0_i32_0 = arith.constant 0 : i32
    %c0_i32_1 = arith.constant 0 : i32
    return %c0_i32, %c0_i32_0 : i32, i32
  }
  func.func @transform_3(%arg0: i32) -> (i32, i32) {
    %c0_i32 = arith.constant 0 : i32
    %c0_i32_0 = arith.constant 0 : i32
    %c0_i32_1 = arith.constant 0 : i32
    return %c0_i32, %c0_i32_0 : i32, i32
  }
  func.func @transform_4(%arg0: i32) -> (i32, i32) {
    %c0_i32 = arith.constant 0 : i32
    %c0_i32_0 = arith.constant 0 : i32
    %c0_i32_1 = arith.constant 0 : i32
    return %c0_i32, %c0_i32_0 : i32, i32
  }
  func.func @transform_5(%arg0: i32) -> (i32, i32) {
    %c0_i32 = arith.constant 0 : i32
    %c0_i32_0 = arith.constant 0 : i32
    %c0_i32_1 = arith.constant 0 : i32
    return %c0_i32, %c0_i32_0 : i32, i32
  }
  func.func @transform_6(%arg0: i32) -> (i32, i32) {
    %c0_i32 = arith.constant 0 : i32
    %c0_i32_0 = arith.constant 0 : i32
    %c0_i32_1 = arith.constant 0 : i32
    return %c0_i32, %c0_i32_0 : i32, i32
  }
  func.func @transform_7(%arg0: i32) -> (i32, i32) {
    %c0_i32 = arith.constant 0 : i32
    %c0_i32_0 = arith.constant 0 : i32
    return %arg0, %c0_i32 : i32, i32
  }
}

</mosaic_0001>

<bundles_post_ra>
// kernel: tpu_custom_call.1
= control target key start
LH: loop header
LB: loop body
LE: loop exit
PB: predicated region body
PF: predicated region fallthrough
CT: control target
= control target key end

     0   :  { %12 = vsyncpa [#allocation3], 0  ;;  %s815_s0 = inlined_call_operand.hbm [shape: f32[2,16], index: 0, kind: input, shape index: {}]   ;;  %s816_s1 = inlined_call_operand.hbm [shape: f32[16,128], index: 1, kind: input, shape index: {}]   ;;  %s817_s2 = inlined_call_operand.vmem [shape: f32[1,128], index: 2, kind: input, shape index: {}]   ;;  %s818_s3 = inlined_call_operand.hbm [shape: f32[128,128], index: 3, kind: input, shape index: {}]   ;;  %s819_s4 = inlined_call_operand.vmem [shape: f32[1,128], index: 4, kind: input, shape index: {}]   ;;  %s820_s5 = inlined_call_operand.hbm [shape: f32[128,128], index: 5, kind: input, shape index: {}]   ;;  %s821_s6 = inlined_call_operand.vmem [shape: f32[1,128], index: 6, kind: input, shape index: {}]   ;;  %s822_s7 = inlined_call_operand.hbm [shape: f32[2,128], index: 7, kind: output, shape index: {}]  }
   0x1   :  { %13 = vsyncpa [#allocation6], 0 }
   0x2   :  { %14 = vsyncpa [#allocation9], 0 }
   0x3   :  { %15 = vsyncpa [#allocation4], 0  ;;  %s667_s24 = smov [#allocation5]   ;;  %s549_s28 = scalar_lea.hbm %s816_s1, 256 }
   0x4   :  { %s31_s25 = sshll.u32 %s667_s24, 4  ;;  %p550_p0 = scmp.ne.s32.totalorder %s816_s1, %s549_s28  ;;  %s32_s25 = int_to_ptr.vmem [resolvable:$true] %s31_s25 }
   0x5   :  { %p553_p1 = scmp.lt.u32.totalorder %s549_s28, %s816_s1 }
   0x7   :  { %p555_p2 = pnand %p553_p1, %p550_p0 }
   0x9   :  { %558 = shalt.err (!%p555_p2)
}
   0xa   :  { %s559_s10 = scalar_lea.vmem %s32_s25, 256  ;;  %p564_p4 = scmp.lt.s32.totalorder %s32_s25, %s32_s25 }
   0xb   :  { %p560_p3 = scmp.ne.s32.totalorder %s32_s25, %s559_s10  ;;  %p565_p5 = scmp.lt.s32.totalorder %s559_s10, %s559_s10 }
   0xd   :  { %p566_p6 = por %p565_p5, %p564_p4 }
   0xf   :  { %p567_p7 = pnand %p566_p6, %p560_p3 }
  0x11   :  { %570 = shalt.err (!%p567_p7)
}
  0x12   :  { %s668_s11 = smov 128   ;;  %s669_s12 = smov 8  }
  0x13   :  { %37 = dma.hbm_to_vmem [thread:$0]  %s816_s1, 256, %s32_s25, [#allocation6], %s668_s11, %s668_s11, %s669_s12  }
  0x14   :  { %s670_s15 = smov [#allocation2]   ;;  %s671_s17 = smov [#allocation7]  }
  0x15   :  { %s22_s16 = sshll.u32 %s670_s15, 4  ;;  %s45_s18 = sshll.u32 %s671_s17, 4  ;;  %s23_s16 = int_to_ptr.vmem [resolvable:$true] %s22_s16  ;;  %s46_s18 = int_to_ptr.vmem [resolvable:$true] %s45_s18 }
  0x16   :  { %s571_s21 = scalar_lea.hbm %s815_s0, 32 }
  0x17   :  { %p572_p8 = scmp.ne.s32.totalorder %s815_s0, %s571_s21  ;;  %p575_p9 = scmp.lt.u32.totalorder %s571_s21, %s815_s0 }
  0x19   :  { %p577_p10 = pnand %p575_p9, %p572_p8 }
  0x1b   :  { %580 = shalt.err (!%p577_p10)
}
  0x1c   :  { %s581_s1 = scalar_lea.vmem %s23_s16, 32  ;;  %p586_p12 = scmp.lt.s32.totalorder %s23_s16, %s23_s16 }
  0x1d   :  { %p582_p11 = scmp.ne.s32.totalorder %s23_s16, %s581_s1  ;;  %p587_p13 = scmp.lt.s32.totalorder %s581_s1, %s581_s1 }
  0x1f   :  { %p588_p0 = por %p587_p13, %p586_p12 }
  0x21   :  { %p589_p1 = pnand %p588_p0, %p582_p11 }
  0x23   :  { %592 = shalt.err (!%p589_p1)
}
  0x24   :  { %25 = dma.hbm_to_vmem [thread:$0]  %s815_s0, 32, %s23_s16, [#allocation3]  }
  0x25   :  { %s593_s30 = scalar_lea.hbm %s818_s3, 2048 }
  0x26   :  { %p594_p2 = scmp.ne.s32.totalorder %s818_s3, %s593_s30  ;;  %p597_p3 = scmp.lt.u32.totalorder %s593_s30, %s818_s3 }
  0x28   :  { %p599_p4 = pnand %p597_p3, %p594_p2 }
  0x2a   :  { %602 = shalt.err (!%p599_p4)
}
  0x2b   :  { %s603_s14 = scalar_lea.vmem %s46_s18, 2048  ;;  %p608_p6 = scmp.lt.s32.totalorder %s46_s18, %s46_s18 }
  0x2c   :  { %p604_p5 = scmp.ne.s32.totalorder %s46_s18, %s603_s14  ;;  %p609_p7 = scmp.lt.s32.totalorder %s603_s14, %s603_s14 }
  0x2e   :  { %p610_p8 = por %p609_p7, %p608_p6 }
  0x30   :  { %p611_p9 = pnand %p610_p8, %p604_p5 }
  0x32   :  { %614 = shalt.err (!%p611_p9)
}
  0x33   :  { %51 = dma.hbm_to_vmem [thread:$0]  %s818_s3, 2048, %s46_s18, [#allocation6], %s668_s11, %s668_s11, %s669_s12  }
  0x34   :  { %s672_s16 = smov [#allocation8]   ;;  %s615_s21 = scalar_lea.hbm %s820_s5, 2048 }
  0x35   :  { %s59_s17 = sshll.u32 %s672_s16, 4  ;;  %p616_p10 = scmp.ne.s32.totalorder %s820_s5, %s615_s21  ;;  %s60_s17 = int_to_ptr.vmem [resolvable:$true] %s59_s17 }
  0x36   :  { %p619_p11 = scmp.lt.u32.totalorder %s615_s21, %s820_s5 }
  0x38   :  { %p621_p12 = pnand %p619_p11, %p616_p10 }
  0x3a   :  { %624 = shalt.err (!%p621_p12)
}
  0x3b   :  { %s625_s1 = scalar_lea.vmem %s60_s17, 2048  ;;  %p630_p0 = scmp.lt.s32.totalorder %s60_s17, %s60_s17 }
  0x3c   :  { %p626_p13 = scmp.ne.s32.totalorder %s60_s17, %s625_s1  ;;  %p631_p1 = scmp.lt.s32.totalorder %s625_s1, %s625_s1 }
  0x3e   :  { %p632_p2 = por %p631_p1, %p630_p0 }
  0x40   :  { %p633_p3 = pnand %p632_p2, %p626_p13 }
  0x42   :  { %636 = shalt.err (!%p633_p3)
}
  0x43   :  { %65 = dma.hbm_to_vmem [thread:$0]  %s820_s5, 2048, %s60_s17, [#allocation9], %s668_s11, %s668_s11, %s669_s12  }
  0x44   :  { %659 = dma.done.wait [#allocation3], 32  }
  0x45   :  { %660 = vsyncadd [#allocation3], 4294967264 }
  0x46   :  { %661 = dma.done.wait [#allocation6], 2304  }
  0x47   :  { %662 = vsyncadd [#allocation6], 4294964992 }
  0x48   :  { %663 = dma.done.wait [#allocation9], 2048  }
  0x49   :  { %664 = vsyncadd [#allocation9], 4294965248  ;;  %v673_v0 = vmov 0.0|0.0   ;;  %vm674_vm0 = vmmov 0   ;;  %v675_v1 = vmov 0.0   ;;  %v81_v2 = vld [vmem:[#allocation5] sm:$0xff] }
  0x4a   :  { %488 = vmatprep.subr.bf16.mxu0 %v673_v0  ;;  %415 = vmatprep.mubr.msk.f32.mxu0 %vm674_vm0, %v675_v1  ;;  %v82_v3 = vld [vmem:[#allocation5 + $0x8] sm:$0xff]  ;;  %v165_v5 = vld [vmem:[#allocation7] sm:$0xff]  ;;  %v166_v6 = vld [vmem:[#allocation7 + $0x8] sm:$0xff]  ;;  %vm90_vm1 = vcmask 130048   ;;  %s676_s28 = smov [#allocation10]  }
  0x4b   :  { %491 = vmatprep.subr.bf16.mxu1 %v673_v0  ;;  %450 = vmatprep.mubr.msk.f32.mxu1 %vm674_vm0, %v675_v1  ;;  %v489_v4 = vpack.c.bf16 %v82_v3, %v81_v2  ;;  %v167_v7 = vld [vmem:[#allocation7 + $0x10] sm:$0xff]  ;;  %v492_v8 = vpack.c.bf16 %v166_v6, %v165_v5  ;;  %v168_v9 = vld [vmem:[#allocation7 + $0x18] sm:$0xff]  ;;  %v80_v10 = vld [vmem:[#allocation2] sm:$0x3]  ;;  %s359_s29 = sshll.u32 %s676_s28, 4  ;;  %s360_s29 = int_to_ptr.vmem [resolvable:$true] %s359_s29 }
  0x4c   :  { %v495_v11 = vpack.c.bf16 %v168_v9, %v167_v7  ;;  %v169_v12 = vld [vmem:[#allocation7 + $0x20] sm:$0xff]  ;;  %v170_v13 = vld [vmem:[#allocation7 + $0x28] sm:$0xff]  ;;  %v171_v15 = vld [vmem:[#allocation7 + $0x30] sm:$0xff]  ;;  %s637_s30 = scalar_lea.vmem %s360_s29, 32  ;;  %p642_p5 = scmp.lt.s32.totalorder %s360_s29, %s360_s29 }
  0x4d   :  { %490 = vmatpush3.bf16.msra.mxu0 %v489_v4  ;;  %493 = vmatpush3.bf16.msra.mxu1 %v492_v8  ;;  %v498_v14 = vpack.c.bf16 %v170_v13, %v169_v12  ;;  %v172_v16 = vld [vmem:[#allocation7 + $0x38] sm:$0xff]  ;;  %v173_v18 = vld [vmem:[#allocation7 + $0x40] sm:$0xff]  ;;  %v174_v19 = vld [vmem:[#allocation7 + $0x48] sm:$0xff]  ;;  %p638_p4 = scmp.ne.s32.totalorder %s360_s29, %s637_s30  ;;  %p643_p6 = scmp.lt.s32.totalorder %s637_s30, %s637_s30 }
  0x4e   :  { %515 = vmatprep.subr.bf16.mxu0 %v673_v0  ;;  %494 = vmatprep.subr.bf16.mxu1 %v673_v0  ;;  %v501_v17 = vpack.c.bf16 %v172_v16, %v171_v15  ;;  %v504_v20 = vpack.c.bf16 %v174_v19, %v173_v18  ;;  %v175_v21 = vld [vmem:[#allocation7 + $0x50] sm:$0xff]  ;;  %v176_v22 = vld [vmem:[#allocation7 + $0x58] sm:$0xff]  ;;  %v177_v24 = vld [vmem:[#allocation7 + $0x60] sm:$0xff] }
  0x4f   :  { %v507_v23 = vpack.c.bf16 %v176_v22, %v175_v21  ;;  %v178_v25 = vld [vmem:[#allocation7 + $0x68] sm:$0xff]  ;;  %v179_v27 = vld [vmem:[#allocation7 + $0x70] sm:$0xff]  ;;  %v180_v28 = vld [vmem:[#allocation7 + $0x78] sm:$0xff]  ;;  %p644_p7 = por %p643_p6, %p642_p5 }
  0x50   :  { %416 = vmatmul.mubr.msk.f32.vlgmr.msra.gmra.mrb[0].mxu0 %vm90_vm1, %v80_v10  ;;  %v510_v26 = vpack.c.bf16 %v178_v25, %v177_v24  ;;  %v513_v29 = vpack.c.bf16 %v180_v28, %v179_v27  ;;  %v259_v30 = vld [vmem:[#allocation8] sm:$0xff]  ;;  %v260_v31 = vld [vmem:[#allocation8 + $0x8] sm:$0xff]  ;;  %v261_v32 = vld [vmem:[#allocation8 + $0x10] sm:$0xff] }
  0x51   :  { %485 = vmatprep.mubr.msk.f32.mxu0 %vm674_vm0, %v675_v1  ;;  %496 = vmatpush3.bf16.msra.mxu1 %v495_v11  ;;  %v516_v33 = vpack.c.bf16 %v260_v31, %v259_v30  ;;  %v262_v34 = vld [vmem:[#allocation8 + $0x18] sm:$0xff]  ;;  %v263_v36 = vld [vmem:[#allocation8 + $0x20] sm:$0xff]  ;;  %v264_v37 = vld [vmem:[#allocation8 + $0x28] sm:$0xff]  ;;  %p645_p8 = pnand %p644_p7, %p638_p4 }
  0x52   :  { %497 = vmatprep.subr.bf16.mxu1 %v673_v0  ;;  %v519_v35 = vpack.c.bf16 %v262_v34, %v261_v32  ;;  %v522_v38 = vpack.c.bf16 %v264_v37, %v263_v36  ;;  %v265_v39 = vld [vmem:[#allocation8 + $0x30] sm:$0xff]  ;;  %v266_v40 = vld [vmem:[#allocation8 + $0x38] sm:$0xff]  ;;  %v267_v42 = vld [vmem:[#allocation8 + $0x40] sm:$0xff] }
  0x53   :  { %517 = vmatpush3.bf16.msra.mxu0 %v516_v33  ;;  %v525_v41 = vpack.c.bf16 %v266_v40, %v265_v39  ;;  %v268_v43 = vld [vmem:[#allocation8 + $0x48] sm:$0xff]  ;;  %v269_v45 = vld [vmem:[#allocation8 + $0x50] sm:$0xff]  ;;  %v270_v46 = vld [vmem:[#allocation8 + $0x58] sm:$0xff] }
  0x54   :  { %518 = vmatprep.subr.bf16.mxu0 %v673_v0  ;;  %v528_v44 = vpack.c.bf16 %v268_v43, %v267_v42  ;;  %v531_v47 = vpack.c.bf16 %v270_v46, %v269_v45  ;;  %v271_v48 = vld [vmem:[#allocation8 + $0x60] sm:$0xff]  ;;  %v272_v49 = vld [vmem:[#allocation8 + $0x68] sm:$0xff]  ;;  %v273_v56 = vld [vmem:[#allocation8 + $0x70] sm:$0xff] }
  0x55   :  { %499 = vmatpush3.bf16.msra.mxu1 %v498_v14  ;;  %v534_v50 = vpack.c.bf16 %v272_v49, %v271_v48  ;;  %v370_v51 = vld [vmem:[%s817_s2] ss:$0 sm:$0xff]  ;;  %v274_v57 = vld [vmem:[#allocation8 + $0x78] sm:$0xff] }
  0x56   :  { %500 = vmatprep.subr.bf16.mxu1 %v673_v0  ;;  %v537_v58 = vpack.c.bf16 %v274_v57, %v273_v56  ;;  %v372_v59 = vld [vmem:[%s819_s4] ss:$0 sm:$0xff] }
  0x57   :  { %520 = vmatpush3.bf16.msra.mxu0 %v519_v35 }
  0x58   :  { %521 = vmatprep.subr.bf16.mxu0 %v673_v0 }
  0x59   :  { %502 = vmatpush3.bf16.msra.mxu1 %v501_v17 }
  0x5a   :  { %503 = vmatprep.subr.bf16.mxu1 %v673_v0 }
  0x5b   :  { %523 = vmatpush3.bf16.msra.mxu0 %v522_v38 }
  0x5c   :  { %524 = vmatprep.subr.bf16.mxu0 %v673_v0 }
  0x5d   :  { %505 = vmatpush3.bf16.msra.mxu1 %v504_v20 }
  0x5e   :  { %506 = vmatprep.subr.bf16.mxu1 %v673_v0 }
  0x5f   :  { %526 = vmatpush3.bf16.msra.mxu0 %v525_v41 }
  0x60   :  { %527 = vmatprep.subr.bf16.mxu0 %v673_v0 }
  0x61   :  { %508 = vmatpush3.bf16.msra.mxu1 %v507_v23 }
  0x62   :  { %509 = vmatprep.subr.bf16.mxu1 %v673_v0 }
  0x63   :  { %529 = vmatpush3.bf16.msra.mxu0 %v528_v44 }
  0x64   :  { %530 = vmatprep.subr.bf16.mxu0 %v673_v0 }
  0x65   :  { %511 = vmatpush3.bf16.msra.mxu1 %v510_v26 }
  0x66   :  { %512 = vmatprep.subr.bf16.mxu1 %v673_v0 }
  0x67   :  { %532 = vmatpush3.bf16.msra.mxu0 %v531_v47 }
  0x68   :  { %533 = vmatprep.subr.bf16.mxu0 %v673_v0 }
  0x69   :  { %514 = vmatpush3.bf16.msra.mxu1 %v513_v29 }
  0x6b   :  { %535 = vmatpush3.bf16.msra.mxu0 %v534_v50 }
  0x6c   :  { %536 = vmatprep.subr.bf16.mxu0 %v673_v0  ;;  %v373_v0 = vld [vmem:[%s821_s6] ss:$0 sm:$0xff] }
  0x6f   :  { %538 = vmatpush3.bf16.msra.mxu0 %v537_v58 }
 0x123   :  { %v160_v52 = vpop.f32.mrb[0].mxu0 }
 0x124   :  { %v161_v53 = vadd.f32 %v370_v51, %v160_v52  ;;  %v417_v54 = vpop.f32.mrb[1].mxu0 }
 0x126   :  { %v164_v55 = vmax.f32 %v161_v53, 0.0 }
 0x128   :  { %451 = vmatmul.mubr.f32.vlgmr.msra.gmra.mrb[0].mxu1 %v164_v55 }
 0x1fb   :  { %v254_v60 = vpop.f32.mrb[0].mxu1 }
 0x1fc   :  { %v255_v61 = vadd.f32 %v372_v59, %v254_v60  ;;  %v452_v62 = vpop.f32.mrb[1].mxu1 }
 0x1fe   :  { %v258_v63 = vmax.f32 %v255_v61, 0.0 }
 0x200   :  { %486 = vmatmul.mubr.f32.vlgmr.msra.gmra.mrb[2].mxu0 %v258_v63 }
 0x2d3   :  { %v348_v1 = vpop.f32.mrb[2].mxu0 }
 0x2d4   :  { %v349_v2 = vadd.f32 %v373_v0, %v348_v1  ;;  %v487_v3 = vpop.f32.mrb[3].mxu0 }
 0x2d6   :  { %352 = vst [vmem:[#allocation10] sm:$0x3] %v349_v2 }
 0x2d7   :  { %648 = shalt.err (!%p645_p8)
}
 0x2d8   :  { %s649_s9 = scalar_lea.hbm %s822_s7, 32 }
 0x2d9   :  { %p650_p9 = scmp.ne.s32.totalorder %s822_s7, %s649_s9  ;;  %p653_p10 = scmp.lt.u32.totalorder %s649_s9, %s822_s7 }
 0x2db   :  { %p655_p11 = pnand %p653_p10, %p650_p9 }
 0x2dd   :  { %658 = shalt.err (!%p655_p11)
}
 0x2de   :  { %362 = dma.vmem_to_hbm [thread:$0]  %s360_s29, 32, %s822_s7, [#allocation4]  }
 0x2df   :  { %665 = dma.done.wait [#allocation4], 32  }
 0x2e0   :  { %666 = vsyncadd [#allocation4], 4294967264 }
 0x2e1   :  { %366 = vsyncpa [#allocation3], 1 }
 0x2e2   :  { %367 = vsyncpa [#allocation6], 1 }
 0x2e3   :  { %368 = vsyncpa [#allocation9], 1 }
 0x2e4   :  { %369 = vsyncpa [#allocation4], 1 }

</bundles_post_ra>
